<compile_context>
chip_gen: v6e
topology: v6e:2x2x1
jax: 0.10.0
libtpu: 0.0.40
codegen_flags: <defaults>
</compile_context>

<pallas_src>
import functools
from typing import NamedTuple

import jax
import jax.numpy as jnp
from jax.experimental import pallas as pl
from jax.experimental.pallas import tpu as pltpu

LANE = 128      # vreg lane width
SUBLANE = 16    # bf16 sublane packing (also a valid multiple for f32)


def _round_up(x, m):
    return (x + m - 1) // m * m


class ForwardMeta(NamedTuple):
    s: int       # output_size (state feature dim / layer-2 output dim)
    a: int       # action_size
    h: int       # hidden_size
    k_pad: int   # padded layer-1 input width (lanes)
    h_pad: int   # padded hidden width
    s_pad: int   # padded output width
    a_pad: int   # padded action width (split path only; 0 when folded)
    fold: bool   # one-hot folded into the state tile's zero padding


# ---------------------------------------------------------------------------
# Kernels
# ---------------------------------------------------------------------------
def _fwd_kernel_folded(state_ref, action_ref, w1_ref, b1_ref, w2_ref, b2_ref,
                       out_ref, *, s_off, a_size):
    """Layer-1 one-hot folded into the zero-padded lanes of the state tile."""
    x = state_ref[...]                                   # (TB, K_pad) compute dtype
    act = action_ref[...]                                # (TB, 1) int32
    lane = jax.lax.broadcasted_iota(jnp.int32, x.shape, 1)
    valid = jnp.logical_and(act >= 0, act < a_size)      # OOB action -> zero row
    x = x + jnp.logical_and(lane == act + s_off, valid).astype(x.dtype)

    h = jnp.dot(x, w1_ref[...], preferred_element_type=jnp.float32)
    h = jnp.maximum(h + b1_ref[...], 0.0)                # f32 bias + ReLU (v5e-safe)

    y = jnp.dot(h.astype(w2_ref.dtype), w2_ref[...],
                preferred_element_type=jnp.float32)
    out_ref[...] = (y + b2_ref[...]).astype(out_ref.dtype)


def _fwd_kernel_split(state_ref, action_ref, w1s_ref, w1a_ref, b1_ref,
                      w2_ref, b2_ref, out_ref, *, a_size):
    """Fallback when the one-hot does not fit in the state tile padding."""
    state = state_ref[...]                                # (TB, K_pad)
    act = action_ref[...]                                 # (TB, 1) int32
    tb = state.shape[0]
    a_pad = w1a_ref.shape[0]

    h = jnp.dot(state, w1s_ref[...], preferred_element_type=jnp.float32)
    lane = jax.lax.broadcasted_iota(jnp.int32, (tb, a_pad), 1)
    valid = jnp.logical_and(act >= 0, act < a_size)
    ohe = jnp.logical_and(lane == act, valid).astype(w1a_ref.dtype)
    h = h + jnp.dot(ohe, w1a_ref[...], preferred_element_type=jnp.float32)
    h = jnp.maximum(h + b1_ref[...], 0.0)

    y = jnp.dot(h.astype(w2_ref.dtype), w2_ref[...],
                preferred_element_type=jnp.float32)
    out_ref[...] = (y + b2_ref[...]).astype(out_ref.dtype)


# ---------------------------------------------------------------------------
# One-time parameter packing (pad + cast outside the per-call hot path)
# ---------------------------------------------------------------------------
def pack_params(params, *, compute_dtype=jnp.bfloat16):
    """Pads/casts weights once.  Returns (meta, tuple_of_padded_arrays)."""
    w1, b1, w2, b2 = params["w1"], params["b1"], params["w2"], params["b2"]
    SA, H = w1.shape
    H2, S = w2.shape
    assert H2 == H
    A = SA - S

    S_pad = _round_up(S, LANE)
    H_pad = _round_up(H, LANE)
    fold = (S + A) <= S_pad                 # one-hot fits inside existing padding

    b1_p = jnp.zeros((1, H_pad), jnp.float32).at[0, :H].set(b1.astype(jnp.float32))
    b2_p = jnp.zeros((1, S_pad), jnp.float32).at[0, :S].set(b2.astype(jnp.float32))
    w2_p = jnp.zeros((H_pad, S_pad), compute_dtype).at[:H, :S].set(
        w2.astype(compute_dtype))

    if fold:
        # Whole W1 (state rows 0..S, action rows S..S+A) in one padded slab.
        w1_p = jnp.zeros((S_pad, H_pad), compute_dtype).at[:S + A, :H].set(
            w1.astype(compute_dtype))
        meta = ForwardMeta(S, A, H, S_pad, H_pad, S_pad, 0, True)
        return meta, (w1_p, b1_p, w2_p, b2_p)

    A_pad = _round_up(max(A, 1), SUBLANE)
    w1s = jnp.zeros((S_pad, H_pad), compute_dtype).at[:S, :H].set(
        w1[:S].astype(compute_dtype))
    w1a = jnp.zeros((A_pad, H_pad), compute_dtype).at[:A, :H].set(
        w1[S:].astype(compute_dtype))
    meta = ForwardMeta(S, A, H, S_pad, H_pad, S_pad, A_pad, False)
    return meta, (w1s, w1a, b1_p, w2_p, b2_p)


# ---------------------------------------------------------------------------
# Forward call
# ---------------------------------------------------------------------------
@functools.partial(jax.jit, static_argnames=("meta", "block_b", "out_dtype"))
def forward_module(state, action, packed, *, meta, block_b=512,
                   out_dtype=jnp.bfloat16):
    """Mirrors Forward.forward(state, action).

    state:  (B, output_size) float
    action: (B,) or (B, 1) integer action indices
    packed: arrays from pack_params(); meta: matching ForwardMeta (static)
    """
    B = state.shape[0]
    S = meta.s
    K_pad, H_pad, S_pad = meta.k_pad, meta.h_pad, meta.s_pad
    cd = packed[0].dtype

    # Batch tile: big enough to amortize per-grid-step overhead, but >= 2 grid
    # steps at larger B so ("parallel",) can use both v7x TensorCores.
    if B <= SUBLANE:
        TB = SUBLANE
    else:
        TB = max(SUBLANE, min(block_b, _round_up((B + 1) // 2, SUBLANE)))
    B_pad = _round_up(B, TB)
    grid = (B_pad // TB,)

    # Per-call activation padding only (weights were padded once in pack_params).
    state_p = jnp.zeros((B_pad, K_pad), cd).at[:B, :S].set(state.astype(cd))
    action_p = jnp.zeros((B_pad, 1), jnp.int32).at[:B, :].set(
        jnp.reshape(action, (B, 1)).astype(jnp.int32))

    tile = lambda shape: pl.BlockSpec(shape, lambda i: (i, 0))       # batch-tiled
    resident = lambda shape: pl.BlockSpec(shape, lambda i: (0, 0))   # VMEM-resident

    if meta.fold:
        kernel = functools.partial(_fwd_kernel_folded, s_off=S, a_size=meta.a)
        operands = (state_p, action_p) + tuple(packed)   # w1, b1, w2, b2
        in_specs = [
            tile((TB, K_pad)), tile((TB, 1)),
            resident((K_pad, H_pad)), resident((1, H_pad)),
            resident((H_pad, S_pad)), resident((1, S_pad)),
        ]
        w1_rows = K_pad
    else:
        kernel = functools.partial(_fwd_kernel_split, a_size=meta.a)
        operands = (state_p, action_p) + tuple(packed)   # w1s, w1a, b1, w2, b2
        in_specs = [
            tile((TB, K_pad)), tile((TB, 1)),
            resident((K_pad, H_pad)), resident((meta.a_pad, H_pad)),
            resident((1, H_pad)),
            resident((H_pad, S_pad)), resident((1, S_pad)),
        ]
        w1_rows = K_pad + meta.a_pad

    # Explicit VMEM budget (insurance for larger H/S; capped at v7x physical).
    cbytes = cd.itemsize
    obytes = jnp.dtype(out_dtype).itemsize
    weight_bytes = (w1_rows * H_pad + H_pad * S_pad) * cbytes + (H_pad + S_pad) * 4
    tile_bytes = TB * (K_pad * cbytes + 4 + S_pad * obytes)
    vmem_limit = int(min(max(2 * weight_bytes + 3 * tile_bytes, 32 << 20), 64 << 20))

    out = pl.pallas_call(
        kernel,
        out_shape=jax.ShapeDtypeStruct((B_pad, S_pad), out_dtype),
        grid=grid,
        in_specs=in_specs,
        out_specs=tile((TB, S_pad)),          # lane-dense (multiple of 128) stores
        compiler_params=pltpu.CompilerParams(
            dimension_semantics=("parallel",),
            vmem_limit_bytes=vmem_limit),
    )(*operands)

    return out[:B, :S]


# ---------------------------------------------------------------------------
# Reference, init, tests
# ---------------------------------------------------------------------------
def _reference(state, action, params, compute_dtype=jnp.bfloat16):
    """Pure-JAX reference with the same bf16 operands / f32 accumulation."""
    S = params["w2"].shape[1]
    A = params["w1"].shape[0] - S
    ohe = jax.nn.one_hot(jnp.reshape(action, (-1,)), A, dtype=jnp.float32)
    x = jnp.concatenate([state, ohe], axis=1).astype(compute_dtype)
    h = jnp.dot(x, params["w1"].astype(compute_dtype),
                preferred_element_type=jnp.float32)
    h = jnp.maximum(h + params["b1"], 0.0)
    return jnp.dot(h.astype(compute_dtype), params["w2"].astype(compute_dtype),
                   preferred_element_type=jnp.float32) + params["b2"]


def init_params(key, output_size, action_size, hidden_size):
    """Deterministic synthetic init (PyTorch Linear shapes, stored [in, out])."""
    in1 = output_size + action_size
    k1, k2, k3, k4 = jax.random.split(key, 4)
    lim1 = 1.0 / jnp.sqrt(in1)
    lim2 = 1.0 / jnp.sqrt(hidden_size)
    return {
        "w1": jax.random.uniform(k1, (in1, hidden_size), jnp.float32, -lim1, lim1),
        "b1": jax.random.uniform(k2, (hidden_size,), jnp.float32, -lim1, lim1),
        "w2": jax.random.uniform(k3, (hidden_size, output_size), jnp.float32, -lim2, lim2),
        "b2": jax.random.uniform(k4, (output_size,), jnp.float32, -lim2, lim2),
    }


def _run_case(key, B, out_size, action_size, hidden):
    k_params, k_state, k_action = jax.random.split(key, 3)
    params = init_params(k_params, out_size, action_size, hidden)
    state = jax.random.normal(k_state, (B, out_size), jnp.float32)
    action = jax.random.randint(k_action, (B, 1), 0, action_size, jnp.int32)

    meta, packed = pack_params(params)              # pad/cast weights once
    out = forward_module(state, action, packed, meta=meta)
    out = jax.block_until_ready(out)
    assert out.shape == (B, out_size), out.shape

    ref = _reference(state, action, params)
    assert jnp.allclose(out.astype(jnp.float32), ref, atol=3e-2, rtol=3e-2), \
        float(jnp.max(jnp.abs(out.astype(jnp.float32) - ref)))
    return meta


if __name__ == "__main__":
    key = jax.random.PRNGKey(0)
    k1, k2 = jax.random.split(key)

    # Case 1: shapes consistent with the module (batch=8, output=16, action=4,
    # hidden=32) -> exercises the folded one-hot path (single W1 matmul).
    meta1 = _run_case(k1, B=8, out_size=16, action_size=4, hidden=32)
    assert meta1.fold

    # Case 2: output size a multiple of 128 -> one-hot cannot hide in padding,
    # exercises the split-weight fallback path and a multi-step batch grid.
    meta2 = _run_case(k2, B=40, out_size=256, action_size=4, hidden=64)
    assert not meta2.fold

    # TODO(synk): the torch module's `.to(device)` / cuda assert has no Pallas
    # equivalent; device placement is handled by JAX.
    print("KERNEL_OK")
</pallas_src>

<mosaic_0001>
module attributes {stable_mosaic.version = 11 : i64} {
  func.func @_fwd_kernel_folded(%arg0: i32, %arg1: memref<16x128xbf16, #tpu.memory_space<vmem>>, %arg2: memref<16x1xi32, #tpu.memory_space<vmem>>, %arg3: memref<128x128xbf16, #tpu.memory_space<vmem>>, %arg4: memref<1x128xf32, #tpu.memory_space<vmem>>, %arg5: memref<128x128xbf16, #tpu.memory_space<vmem>>, %arg6: memref<1x128xf32, #tpu.memory_space<vmem>>, %arg7: memref<16x128xbf16, #tpu.memory_space<vmem>>) attributes {dimension_semantics = [#tpu.dimension_semantics<parallel>], iteration_bounds = array<i64: 1>, scalar_prefetch = 0 : i64, scratch_operands = 0 : i64, tpu.core_type = #tpu.core_type<tc>, window_params = [{transform_indices = @transform_0, window_bounds = array<i64: 16, 128>}, {transform_indices = @transform_1, window_bounds = array<i64: 16, 1>}, {pipeline_mode = #tpu.pipeline_mode<synchronous>, transform_indices = @transform_2, window_bounds = array<i64: 128, 128>}, {pipeline_mode = #tpu.pipeline_mode<synchronous>, transform_indices = @transform_3, window_bounds = array<i64: 1, 128>}, {pipeline_mode = #tpu.pipeline_mode<synchronous>, transform_indices = @transform_4, window_bounds = array<i64: 128, 128>}, {pipeline_mode = #tpu.pipeline_mode<synchronous>, transform_indices = @transform_5, window_bounds = array<i64: 1, 128>}, {transform_indices = @transform_6, window_bounds = array<i64: 16, 128>}]} {
    %c0 = arith.constant 0 : index
    %c0_0 = arith.constant 0 : index
    %0 = vector.load %arg1[%c0, %c0_0] : memref<16x128xbf16, #tpu.memory_space<vmem>>, vector<16x128xbf16>
    %c0_1 = arith.constant 0 : index
    %c0_2 = arith.constant 0 : index
    %1 = vector.load %arg2[%c0_1, %c0_2] : memref<16x1xi32, #tpu.memory_space<vmem>>, vector<16x1xi32>
    %2 = tpu.iota {dimensions = array<i32: 1>} : vector<16x128xi32>
    %c0_i32 = arith.constant 0 : i32
    %3 = vector.broadcast %c0_i32 : i32 to vector<16x1xi32>
    %4 = arith.cmpi sge, %1, %3 : vector<16x1xi32>
    %c4_i32 = arith.constant 4 : i32
    %5 = vector.broadcast %c4_i32 : i32 to vector<16x1xi32>
    %6 = arith.cmpi slt, %1, %5 : vector<16x1xi32>
    %7 = arith.andi %4, %6 : vector<16x1xi1>
    %c16_i32 = arith.constant 16 : i32
    %8 = vector.broadcast %c16_i32 : i32 to vector<16x1xi32>
    %9 = arith.addi %1, %8 : vector<16x1xi32>
    %10 = vector.broadcast %9 : vector<16x1xi32> to vector<16x128xi32>
    %11 = arith.cmpi eq, %2, %10 : vector<16x128xi32>
    %12 = vector.broadcast %7 : vector<16x1xi1> to vector<16x128xi1>
    %13 = arith.andi %11, %12 : vector<16x128xi1>
    %14 = arith.extui %13 : vector<16x128xi1> to vector<16x128xi32>
    %15 = arith.sitofp %14 : vector<16x128xi32> to vector<16x128xf32>
    %16 = arith.truncf %15 : vector<16x128xf32> to vector<16x128xbf16>
    %17 = arith.addf %0, %16 : vector<16x128xbf16>
    %c0_3 = arith.constant 0 : index
    %c0_4 = arith.constant 0 : index
    %18 = vector.load %arg3[%c0_3, %c0_4] : memref<128x128xbf16, #tpu.memory_space<vmem>>, vector<128x128xbf16>
    %cst = arith.constant dense<0.000000e+00> : vector<16x128xf32>
    %19 = tpu.matmul %17, %18, %cst {dimension_numbers = #tpu.dot_dimension_numbers<[1], [0], [0], [1], [0, 0, 1, 1], [], []>} : vector<16x128xbf16>, vector<128x128xbf16>, vector<16x128xf32> -> vector<16x128xf32>
    %c0_5 = arith.constant 0 : index
    %c0_6 = arith.constant 0 : index
    %20 = vector.load %arg4[%c0_5, %c0_6] : memref<1x128xf32, #tpu.memory_space<vmem>>, vector<1x128xf32>
    %21 = vector.broadcast %20 : vector<1x128xf32> to vector<16x128xf32>
    %22 = arith.addf %19, %21 : vector<16x128xf32>
    %cst_7 = arith.constant 0.000000e+00 : f32
    %23 = vector.broadcast %cst_7 : f32 to vector<16x128xf32>
    %24 = arith.maximumf %22, %23 : vector<16x128xf32>
    %25 = arith.truncf %24 : vector<16x128xf32> to vector<16x128xbf16>
    %c0_8 = arith.constant 0 : index
    %c0_9 = arith.constant 0 : index
    %26 = vector.load %arg5[%c0_8, %c0_9] : memref<128x128xbf16, #tpu.memory_space<vmem>>, vector<128x128xbf16>
    %cst_10 = arith.constant dense<0.000000e+00> : vector<16x128xf32>
    %27 = tpu.matmul %25, %26, %cst_10 {dimension_numbers = #tpu.dot_dimension_numbers<[1], [0], [0], [1], [0, 0, 1, 1], [], []>} : vector<16x128xbf16>, vector<128x128xbf16>, vector<16x128xf32> -> vector<16x128xf32>
    %c0_11 = arith.constant 0 : index
    %c0_12 = arith.constant 0 : index
    %28 = vector.load %arg6[%c0_11, %c0_12] : memref<1x128xf32, #tpu.memory_space<vmem>>, vector<1x128xf32>
    %29 = vector.broadcast %28 : vector<1x128xf32> to vector<16x128xf32>
    %30 = arith.addf %27, %29 : vector<16x128xf32>
    %31 = arith.truncf %30 : vector<16x128xf32> to vector<16x128xbf16>
    %c0_13 = arith.constant 0 : index
    %c0_14 = arith.constant 0 : index
    %32 = vector.load %arg7[%c0_13, %c0_14] : memref<16x128xbf16, #tpu.memory_space<vmem>>, vector<16x128xbf16>
    tpu.vector_store %arg7[%c0_13, %c0_14], %31 {strides = array<i32>} : memref<16x128xbf16, #tpu.memory_space<vmem>>, vector<16x128xbf16>,
    return
  }
  func.func @transform_0(%arg0: i32) -> (i32, i32) {
    %c0_i32 = arith.constant 0 : i32
    %c0_i32_0 = arith.constant 0 : i32
    return %arg0, %c0_i32 : i32, i32
  }
  func.func @transform_1(%arg0: i32) -> (i32, i32) {
    %c0_i32 = arith.constant 0 : i32
    %c0_i32_0 = arith.constant 0 : i32
    return %arg0, %c0_i32 : i32, i32
  }
  func.func @transform_2(%arg0: i32) -> (i32, i32) {
    %c0_i32 = arith.constant 0 : i32
    %c0_i32_0 = arith.constant 0 : i32
    %c0_i32_1 = arith.constant 0 : i32
    return %c0_i32, %c0_i32_0 : i32, i32
  }
  func.func @transform_3(%arg0: i32) -> (i32, i32) {
    %c0_i32 = arith.constant 0 : i32
    %c0_i32_0 = arith.constant 0 : i32
    %c0_i32_1 = arith.constant 0 : i32
    return %c0_i32, %c0_i32_0 : i32, i32
  }
  func.func @transform_4(%arg0: i32) -> (i32, i32) {
    %c0_i32 = arith.constant 0 : i32
    %c0_i32_0 = arith.constant 0 : i32
    %c0_i32_1 = arith.constant 0 : i32
    return %c0_i32, %c0_i32_0 : i32, i32
  }
  func.func @transform_5(%arg0: i32) -> (i32, i32) {
    %c0_i32 = arith.constant 0 : i32
    %c0_i32_0 = arith.constant 0 : i32
    %c0_i32_1 = arith.constant 0 : i32
    return %c0_i32, %c0_i32_0 : i32, i32
  }
  func.func @transform_6(%arg0: i32) -> (i32, i32) {
    %c0_i32 = arith.constant 0 : i32
    %c0_i32_0 = arith.constant 0 : i32
    return %arg0, %c0_i32 : i32, i32
  }
}

</mosaic_0001>

<bundles_post_ra>
// kernel: forward_module.1
= control target key start
LH: loop header
LB: loop body
LE: loop exit
PB: predicated region body
PF: predicated region fallthrough
CT: control target
= control target key end

     0   :  { %11 = vsyncpa [#allocation3], 0  ;;  %s472_s21 = smov [#allocation2]   ;;  %s581_s0 = inlined_call_operand.vmem [shape: bf16[16,128], index: 0, kind: input, shape index: {}]   ;;  %s582_s1 = inlined_call_operand.vmem [shape: s32[16,1], index: 1, kind: input, shape index: {}]   ;;  %s583_s2 = inlined_call_operand.hbm [shape: bf16[128,128], index: 2, kind: input, shape index: {}]   ;;  %s584_s3 = inlined_call_operand.vmem [shape: f32[1,128], index: 3, kind: input, shape index: {}]   ;;  %s585_s4 = inlined_call_operand.vmem [shape: bf16[128,128], index: 4, kind: input, shape index: {}]   ;;  %s586_s5 = inlined_call_operand.vmem [shape: f32[1,128], index: 5, kind: input, shape index: {}]   ;;  %s587_s6 = inlined_call_operand.vmem [shape: bf16[16,128], index: 6, kind: output, shape index: {}]  }
   0x1   :  { %s21_s22 = sshll.u32 %s472_s21, 4  ;;  %s22_s22 = int_to_ptr.vmem [resolvable:$true] %s21_s22 }
   0x2   :  { %s458_s23 = scalar_lea.vmem %s22_s22, 1024  ;;  %p463_p1 = scmp.lt.s32.totalorder %s22_s22, %s22_s22 }
   0x3   :  { %p459_p0 = scmp.ne.s32.totalorder %s22_s22, %s458_s23  ;;  %p464_p2 = scmp.lt.s32.totalorder %s458_s23, %s458_s23 }
   0x5   :  { %p465_p3 = por %p464_p2, %p463_p1 }
   0x7   :  { %p466_p4 = pnand %p465_p3, %p459_p0 }
   0x9   :  { %469 = shalt.err (!%p466_p4)
}
   0xa   :  { %s473_s24 = smov 64   ;;  %s474_s25 = smov 4  }
   0xb   :  { %27 = dma.hbm_to_vmem [thread:$0]  %s583_s2, 1024, %s22_s22, [#allocation3], %s473_s24, %s473_s24, %s474_s25  }
   0xc   :  { %470 = dma.done.wait [#allocation3], 1024  }
   0xd   :  { %471 = vsyncadd [#allocation3], 4294966272  ;;  %v475_v0 = vmov 0   ;;  %v476_v1 = vmov 0.0   ;;  %v40_v2 = vld [vmem:[%s582_s1] sm:$0xff]  ;;  %v41_v3 = vld [vmem:[%s582_s1 + $0x8] sm:$0xff]  ;;  %v42_v21 = vlaneseq }
   0xe   :  { %432 = vset.pattern.permute.xlu0 %v475_v0  ;;  %433 = vset.pattern.permute.xlu1 %v475_v0  ;;  %v50_v4 = vadd.s32 16, %v40_v2  ;;  %vm44_vm0 = vcmp.ge.s32.totalorder %v40_v2, 0  ;;  %vm46_vm1 = vcmp.lt.s32.totalorder %v40_v2, 4  ;;  %vm45_vm3 = vcmp.ge.s32.totalorder %v41_v3, 0  ;;  %v434_v5 = vld [vmem:[#allocation2 + $0x38] sm:$0xff]   ;;  %v435_v8 = vld [vmem:[#allocation2 + $0x30] sm:$0xff]  }
   0xf   :  { %386 = vmatprep.subr.bf16.mxu0 %v476_v1  ;;  %406 = vmatprep.subr.bf16.mxu1 %v476_v1  ;;  %vm48_vm2 = vmand %vm44_vm0, %vm46_vm1  ;;  %vm47_vm4 = vcmp.lt.s32.totalorder %v41_v3, 4  ;;  %v51_v7 = vadd.s32 16, %v41_v3  ;;  %v436_v10 = vld [vmem:[#allocation2 + $0x28] sm:$0xff]   ;;  %v437_v11 = vld [vmem:[#allocation2 + $0x20] sm:$0xff]   ;;  %vm477_vm6 = vmmov 0   ;;  %v43_v22 = vand.u32 127, %v42_v21 }
  0x10   :  { %53 = vperm.xlu0 %432, %v50_v4   ;;  %v60_v6 = vsel %vm48_vm2, 1, %v475_v0  ;;  %vm49_vm5 = vmand %vm45_vm3, %vm47_vm4  ;;  %387 = vmatpush3.bf16.msra.mxu0 %v434_v5  ;;  %v442_v12 = vld [vmem:[%s585_s4 + $0x38] sm:$0xff]   ;;  %v443_v14 = vld [vmem:[%s585_s4 + $0x30] sm:$0xff]  }
  0x11   :  { %63 = vperm.xlu1 %433, %v60_v6   ;;  %v61_v9 = vsel %vm49_vm5, 1, %v475_v0  ;;  %388 = vmatprep.subr.bf16.mxu0 %v476_v1  ;;  %v438_v13 = vld [vmem:[#allocation2 + $0x18] sm:$0xff]   ;;  %v444_v15 = vld [vmem:[%s585_s4 + $0x28] sm:$0xff]   ;;  %v439_v16 = vld [vmem:[#allocation2 + $0x10] sm:$0xff]  }
  0x12   :  { %402 = vmatprep.mubr.msk.bf16.mxu0 %vm477_vm6, %v476_v1  ;;  %422 = vmatprep.mubr.msk.bf16.mxu1 %vm477_vm6, %v476_v1  ;;  %v445_v17 = vld [vmem:[%s585_s4 + $0x20] sm:$0xff]   ;;  %v440_v18 = vld [vmem:[#allocation2 + $0x8] sm:$0xff]   ;;  %v446_v19 = vld [vmem:[%s585_s4 + $0x18] sm:$0xff]  }
  0x13   :  { %407 = vmatpush3.bf16.msra.mxu1 %v442_v12  ;;  %v441_v20 = vld [vmem:[#allocation2] sm:$0xff]   ;;  %v447_v36 = vld [vmem:[%s585_s4 + $0x10] sm:$0xff]   ;;  %v448_v37 = vld [vmem:[%s585_s4 + $0x8] sm:$0xff]  }
  0x14   :  { %56 = vperm.xlu0 %432, %v51_v7   ;;  %389 = vmatpush3.bf16.msra.mxu0 %v435_v8  ;;  %v38_v29 = vld [vmem:[%s581_s0] sm:$0xf]  ;;  %v39_v30 = vld [vmem:[%s581_s0 + $0x4] sm:$0xf] }
  0x15   :  { %66 = vperm.xlu1 %433, %v61_v9   ;;  %390 = vmatprep.subr.bf16.mxu0 %v476_v1  ;;  %v449_v38 = vld [vmem:[%s585_s4] sm:$0xff]  }
  0x16   :  { %408 = vmatprep.subr.bf16.mxu1 %v476_v1  ;;  %v338_v39 = vld [vmem:[%s584_s3] ss:$0 sm:$0xff] }
  0x17   :  { %409 = vmatpush3.bf16.msra.mxu1 %v443_v14  ;;  %v348_v50 = vld [vmem:[%s586_s5] ss:$0 sm:$0xff] }
  0x18   :  { %391 = vmatpush3.bf16.msra.mxu0 %v436_v10  ;;  %410 = vmatprep.subr.bf16.mxu1 %v476_v1 }
  0x19   :  { %392 = vmatprep.subr.bf16.mxu0 %v476_v1 }
  0x1b   :  { %411 = vmatpush3.bf16.msra.mxu1 %v444_v15 }
  0x1c   :  { %393 = vmatpush3.bf16.msra.mxu0 %v437_v11  ;;  %412 = vmatprep.subr.bf16.mxu1 %v476_v1 }
  0x1d   :  { %394 = vmatprep.subr.bf16.mxu0 %v476_v1 }
  0x1f   :  { %413 = vmatpush3.bf16.msra.mxu1 %v445_v17 }
  0x20   :  { %395 = vmatpush3.bf16.msra.mxu0 %v438_v13  ;;  %414 = vmatprep.subr.bf16.mxu1 %v476_v1 }
  0x21   :  { %396 = vmatprep.subr.bf16.mxu0 %v476_v1 }
  0x23   :  { %415 = vmatpush3.bf16.msra.mxu1 %v446_v19 }
  0x24   :  { %397 = vmatpush3.bf16.msra.mxu0 %v439_v16  ;;  %416 = vmatprep.subr.bf16.mxu1 %v476_v1 }
  0x25   :  { %398 = vmatprep.subr.bf16.mxu0 %v476_v1 }
  0x27   :  { %417 = vmatpush3.bf16.msra.mxu1 %v447_v36 }
  0x28   :  { %399 = vmatpush3.bf16.msra.mxu0 %v440_v18  ;;  %418 = vmatprep.subr.bf16.mxu1 %v476_v1 }
  0x29   :  { %400 = vmatprep.subr.bf16.mxu0 %v476_v1 }
  0x2b   :  { %419 = vmatpush3.bf16.msra.mxu1 %v448_v37 }
  0x2c   :  { %401 = vmatpush3.bf16.msra.mxu0 %v441_v20  ;;  %420 = vmatprep.subr.bf16.mxu1 %v476_v1 }
  0x2f   :  { %421 = vmatpush3.bf16.msra.mxu1 %v449_v38 }
  0x8b   :  { %v54_v23 = vpop.permute.xlu0 %53 }
  0x8c   :  { %vm58_vm7 = vcmp.eq.s32.totalorder %v43_v22, %v54_v23  ;;  %v64_v24 = vpop.permute.xlu1 %63 }
  0x8d   :  { %vm68_vm8 = vcmp.eq.s32.totalorder %v64_v24, 1 }
  0x8e   :  { %vm70_vm9 = vmand %vm58_vm7, %vm68_vm8 }
  0x8f   :  { %v334_v25 = vsel %vm70_vm9, 1.0, %v476_v1  ;;  %v57_v26 = vpop.permute.xlu0 %56 }
  0x90   :  { %vm59_vm10 = vcmp.eq.s32.totalorder %v43_v22, %v57_v26  ;;  %v67_v27 = vpop.permute.xlu1 %66  ;;  %v359_v28 = vpack.c.bf16 %v334_v25, %v334_v25 }
  0x91   :  { %vm69_vm11 = vcmp.eq.s32.totalorder %v67_v27, 1 }
  0x92   :  { %vm71_vm12 = vmand %vm59_vm10, %vm69_vm11  ;;  %v84_v33 = vadd.bf16 %v359_v28, %v38_v29 }
  0x93   :  { %v335_v31 = vsel %vm71_vm12, 1.0, %v476_v1 }
  0x94   :  { %v360_v32 = vpack.c.bf16 %v335_v31, %v335_v31 }
  0x96   :  { %v85_v34 = vadd.bf16 %v360_v32, %v39_v30 }
  0x98   :  { %v339_v35 = vcombine.low %v84_v33, %v85_v34 }
  0x9a   :  { %403 = vmatmul.mubr.bf16.vlgmr.msra.gmra.mxu0 %v339_v35 }
 0x15a   :  { %v197_v40 = vpop.f32.mrf.mxu0 }
 0x15b   :  { %v198_v42 = vadd.f32 %v338_v39, %v197_v40 }
 0x15c   :  { %v404_v41 = vpop.f32.mrf.mxu0 }
 0x15d   :  { %v204_v46 = vmax.f32 %v198_v42, 0.0 }
 0x15e   :  { %v200_v43 = vpop.f32.mrf.mxu0 }
 0x15f   :  { %v201_v44 = vadd.f32 %v338_v39, %v200_v43 }
 0x160   :  { %v405_v45 = vpop.f32.mrf.mxu0 }
 0x161   :  { %v205_v47 = vmax.f32 %v201_v44, 0.0 }
 0x163   :  { %v206_v48 = vpack.c.bf16 %v205_v47, %v204_v46 }
 0x165   :  { %423 = vmatmul.mubr.bf16.vlgmr.msra.gmra.mxu1 %v206_v48 }
 0x225   :  { %v312_v49 = vpop.f32.mrf.mxu1 }
 0x226   :  { %v313_v53 = vadd.f32 %v348_v50, %v312_v49 }
 0x227   :  { %v424_v51 = vpop.f32.mrf.mxu1 }
 0x229   :  { %v315_v52 = vpop.f32.mrf.mxu1 }
 0x22a   :  { %v316_v54 = vadd.f32 %v348_v50, %v315_v52 }
 0x22b   :  { %v425_v55 = vpop.f32.mrf.mxu1 }
 0x22c   :  { %v366_v56 = vpack.c.bf16 %v316_v54, %v313_v53 }
 0x22e   :  { %367 = vst [vmem:[%s587_s6] sm:$0xff] %v366_v56  }
 0x22f   :  { %333 = vsyncpa [#allocation3], 1 }

</bundles_post_ra>
